<compile_context>
chip_gen: v7x
topology: tpu7x:2x2x1
jax: 0.10.0
libtpu: 0.0.40
codegen_flags: <defaults>
</compile_context>

<pallas_src>
import functools
import math

import jax
import jax.numpy as jnp
from jax import lax
from jax.experimental import pallas as pl
from jax.experimental.pallas import tpu as pltpu


def _round_up(x, m):
    return (x + m - 1) // m * m


# ---------------------------------------------------------------------------
# Path 1: small vocab -> one-hot @ table on the MXU (fully dense).
# ---------------------------------------------------------------------------
def _onehot_kernel(tok_ref, emb_ref, out_ref, *, vocab_size, scale):
    tok = tok_ref[...]                                        # (T, 1) int32
    t = tok.shape[0]
    iota = lax.broadcasted_iota(jnp.int32, (t, vocab_size), 1)
    onehot = (tok == iota).astype(emb_ref.dtype)              # (T, V)
    acc = jnp.dot(onehot, emb_ref[...], preferred_element_type=jnp.float32)
    out_ref[...] = (acc * scale).astype(out_ref.dtype)        # one dense store


# ---------------------------------------------------------------------------
# Path 2: table VMEM-resident, gather 8 rows per iteration, dense (8,E) stores.
# ---------------------------------------------------------------------------
def _gather_kernel(tok_ref, nvalid_ref, emb_ref, out_ref, *, block_tokens, scale):
    del nvalid_ref  # padded ids are in-range (clamped); extra rows sliced off.
    base = pl.program_id(0) * block_tokens
    G = 8                                   # rows per unmasked (8, E) store
    n_groups = block_tokens // G

    def body(g, carry):
        t0 = pl.multiple_of(g * G, G)
        # Issue all 8 scalar id reads up front (no per-row sld->addr->vld chain).
        rows = [tok_ref[base + t0 + j] for j in range(G)]
        vals = [emb_ref[pl.ds(rows[j], 1), :] for j in range(G)]
        blk = jnp.concatenate(vals, axis=0).astype(jnp.float32)   # (8, E)
        # Scale/cast hoisted to the dense (8, E) block; single unmasked store.
        out_ref[pl.ds(t0, G), :] = (blk * scale).astype(out_ref.dtype)
        return carry

    lax.fori_loop(0, n_groups, body, 0, unroll=True)


# ---------------------------------------------------------------------------
# Path 3: huge table in HBM, per-row DMA gather with a deep in-flight window.
# ---------------------------------------------------------------------------
def _dma_gather_kernel(tok_ref, nvalid_ref, emb_hbm, out_ref, buf, sem, *,
                       block_tokens, inflight, scale):
    T, K = block_tokens, inflight
    base = pl.program_id(0) * T
    n_valid = nvalid_ref[0]

    def start_copy(t, row):
        pltpu.make_async_copy(
            emb_hbm.at[pl.ds(row, 1)], buf.at[pl.ds(t, 1)], sem.at[t % K]
        ).start()

    def wait_copy(t):
        # Wait descriptor only needs matching shape/semaphore; row index moot.
        pltpu.make_async_copy(
            emb_hbm.at[pl.ds(0, 1)], buf.at[pl.ds(t, 1)], sem.at[t % K]
        ).wait()

    # Prologue: fill the in-flight window (skip padded rows of the last block).
    @pl.loop(0, min(K, T))
    def _(t):
        @pl.when(base + t < n_valid)
        def _():
            start_copy(t, tok_ref[base + t])

    # Steady state: retire copy (t - K), issue copy t.
    if T > K:
        @pl.loop(K, T)
        def _(t):
            # Read the scalar for the copy we're ABOUT to issue before the
            # wait: .wait() breaks SMEM sst->sld forwarding.
            row = tok_ref[base + t]
            do_issue = base + t < n_valid

            @pl.when(base + (t - K) < n_valid)
            def _():
                wait_copy(t - K)

            @pl.when(do_issue)
            def _():
                start_copy(t, row)

    # Epilogue: retire the tail.
    @pl.loop(max(0, T - K), T)
    def _(t):
        @pl.when(base + t < n_valid)
        def _():
            wait_copy(t)

    # One dense (T, E) scale + store (full-vreg, unmasked writes).
    out_ref[...] = (buf[...].astype(jnp.float32) * scale).astype(out_ref.dtype)


# ---------------------------------------------------------------------------
# Dispatch / wrapper
# ---------------------------------------------------------------------------
def _derive_vmem_budgets():
    """Generation-aware VMEM limit + resident-table budget."""
    try:
        cap = int(pltpu.get_tpu_info().vmem_capacity_bytes)
    except Exception:
        cap = 128 * 1024 * 1024            # v5e/v6e default; v7x has 64 MiB/TC
    # 3/4 of physical VMEM (>= 32 MiB, <= 112 MiB): ~48 MiB on v7x, ~96 MiB on
    # v5e/v6e -- keeps much larger tables on the resident fast paths.
    limit = max(32 * 1024 * 1024, min((cap * 3) // 4, 112 * 1024 * 1024))
    headroom = 8 * 1024 * 1024             # out/tok double-buffers + scratch
    # Assume the pipeliner may keep two copies of the resident table.
    table_budget = max(0, (limit - headroom) // 2)
    return limit, table_budget


def _token_embedding_call(tok_flat, emb_table, *, block_tokens, inflight,
                          force_path, table_budget, vmem_limit,
                          onehot_vocab_max):
    vocab_size, emb_size = emb_table.shape
    scale = math.sqrt(emb_size)
    n_tok = tok_flat.shape[0]

    # T tokens per grid step: multiple of 8 -> sublane-dense output blocks.
    T = min(_round_up(block_tokens, 8), _round_up(n_tok, 8))
    n_pad = _round_up(n_tok, T)
    if n_pad != n_tok:
        tok_flat = jnp.pad(tok_flat, (0, n_pad - n_tok))
    grid = (n_pad // T,)

    table_bytes = vocab_size * emb_size * emb_table.dtype.itemsize
    resident = table_bytes <= table_budget
    if resident and vocab_size <= onehot_vocab_max:
        path = "onehot"
    elif resident:
        path = "gather"
    else:
        path = "dma"
    if force_path is not None:
        path = force_path

    compiler_params = pltpu.CompilerParams(
        # Each grid step writes a distinct output block -> token-block axis is
        # shardable across TensorCores (v7x megacore); no-op on v5e/v6e.
        dimension_semantics=("parallel",),
        vmem_limit_bytes=int(vmem_limit),
    )
    out_shape = jax.ShapeDtypeStruct((n_pad, emb_size), emb_table.dtype)

    if path == "onehot":
        tok_2d = tok_flat.reshape(n_pad, 1)
        grid_spec = pltpu.PrefetchScalarGridSpec(
            num_scalar_prefetch=0,
            grid=grid,
            in_specs=[
                pl.BlockSpec((T, 1), lambda i: (i, 0)),
                # Whole table VMEM-resident (constant block index).
                pl.BlockSpec((vocab_size, emb_size), lambda i: (0, 0)),
            ],
            out_specs=pl.BlockSpec((T, emb_size), lambda i: (i, 0)),
        )
        kernel = functools.partial(_onehot_kernel, vocab_size=vocab_size,
                                   scale=scale)
        return pl.pallas_call(
            kernel, grid_spec=grid_spec, out_shape=out_shape,
            compiler_params=compiler_params,
        )(tok_2d, emb_table)

    n_valid = jnp.array([n_tok], dtype=jnp.int32)
    out_spec = pl.BlockSpec((T, emb_size), lambda i, tok, nv: (i, 0))

    if path == "gather":
        grid_spec = pltpu.PrefetchScalarGridSpec(
            num_scalar_prefetch=2,
            grid=grid,
            in_specs=[
                pl.BlockSpec((vocab_size, emb_size), lambda i, tok, nv: (0, 0)),
            ],
            out_specs=out_spec,
        )
        kernel = functools.partial(_gather_kernel, block_tokens=T, scale=scale)
    elif path == "dma":
        K = max(1, min(inflight, T))
        grid_spec = pltpu.PrefetchScalarGridSpec(
            num_scalar_prefetch=2,
            grid=grid,
            in_specs=[pl.BlockSpec(memory_space=pl.ANY)],   # raw HBM table
            out_specs=out_spec,
            scratch_shapes=[
                pltpu.VMEM((T, emb_size), emb_table.dtype),
                pltpu.SemaphoreType.DMA((K,)),
            ],
        )
        kernel = functools.partial(_dma_gather_kernel, block_tokens=T,
                                   inflight=K, scale=scale)
    else:
        raise ValueError(f"unknown path {path!r}")

    return pl.pallas_call(
        kernel, grid_spec=grid_spec, out_shape=out_shape,
        compiler_params=compiler_params,
    )(tok_flat, n_valid, emb_table)


def token_embedding(tokens, emb_table, *, block_tokens=256, inflight=16,
                    table_vmem_budget_bytes=None, vmem_limit_bytes=None,
                    onehot_vocab_max=2048, force_path=None,
                    max_tokens_per_call=1 << 15):
    """emb_table[tokens] * sqrt(emb_size) via Pallas TPU kernels.

    tokens: int array, any shape.  emb_table: (vocab_size, emb_size).
    Returns tokens.shape + (emb_size,) with emb_table.dtype.
    """
    vocab_size, emb_size = emb_table.shape

    tok_flat = tokens.reshape(-1).astype(jnp.int32)
    # TODO(synk): PyTorch nn.Embedding raises on out-of-range ids; here we
    # clamp so every gather address is in-bounds on TPU.
    tok_flat = jnp.clip(tok_flat, 0, vocab_size - 1)
    n_tok = tok_flat.shape[0]
    if n_tok == 0:
        return jnp.zeros(tokens.shape + (emb_size,), emb_table.dtype)

    vmem_limit, table_budget = _derive_vmem_budgets()
    if vmem_limit_bytes is not None:
        vmem_limit = int(vmem_limit_bytes)
        if table_vmem_budget_bytes is None:
            table_budget = max(0, (vmem_limit - 8 * 1024 * 1024) // 2)
    if table_vmem_budget_bytes is not None:
        table_budget = int(table_vmem_budget_bytes)

    call = functools.partial(
        _token_embedding_call, emb_table=emb_table, block_tokens=block_tokens,
        inflight=inflight, force_path=force_path, table_budget=table_budget,
        vmem_limit=vmem_limit, onehot_vocab_max=onehot_vocab_max)

    # Chunk very long token streams so the SMEM id arrays stay small
    # (1-D SMEM pads to next_pow2(4N)).
    if n_tok > max_tokens_per_call:
        chunks = []
        for s in range(0, n_tok, max_tokens_per_call):
            piece = tok_flat[s:s + max_tokens_per_call]
            chunks.append(call(piece)[: piece.shape[0]])
        out = jnp.concatenate(chunks, axis=0)
    else:
        out = call(tok_flat)[:n_tok]

    return out.reshape(tokens.shape + (emb_size,))


if __name__ == "__main__":
    key = jax.random.PRNGKey(0)
    vocab_size, emb_size = 32, 128
    seq_len, batch = 8, 2

    k_emb, k_tok = jax.random.split(key)
    # Deterministic "parameters" for nn.Embedding(vocab_size, emb_size).
    emb_table = jax.random.normal(k_emb, (vocab_size, emb_size), dtype=jnp.float32)
    tokens = jax.random.randint(k_tok, (seq_len, batch), 0, vocab_size,
                                dtype=jnp.int32)

    ref = emb_table[tokens] * math.sqrt(emb_size)

    # Default dispatch (small vocab -> one-hot MXU path).
    out = jax.block_until_ready(token_embedding(tokens, emb_table))
    assert out.shape == (seq_len, batch, emb_size)
    assert jnp.allclose(out, ref, atol=1e-5, rtol=1e-5)

    # Exercise the VMEM-resident gather path on the same data.
    out_gather = jax.block_until_ready(
        token_embedding(tokens, emb_table, force_path="gather"))
    assert jnp.allclose(out_gather, ref, atol=1e-5, rtol=1e-5)

    # Exercise the large-table manual-DMA gather path on the same data.
    out_dma = jax.block_until_ready(
        token_embedding(tokens, emb_table, force_path="dma"))
    assert jnp.allclose(out_dma, ref, atol=1e-5, rtol=1e-5)

    print("KERNEL_OK")
</pallas_src>

<mosaic_0001>
module attributes {stable_mosaic.version = 11 : i64} {
  func.func @_onehot_kernel(%arg0: i32, %arg1: memref<16x1xi32, #tpu.memory_space<vmem>>, %arg2: memref<32x128xf32, #tpu.memory_space<vmem>>, %arg3: memref<16x128xf32, #tpu.memory_space<vmem>>) attributes {dimension_semantics = [#tpu.dimension_semantics<parallel>], iteration_bounds = array<i64: 1>, scalar_prefetch = 0 : i64, scratch_operands = 0 : i64, tpu.core_type = #tpu.core_type<tc>, window_params = [{transform_indices = @transform_0, window_bounds = array<i64: 16, 1>}, {pipeline_mode = #tpu.pipeline_mode<synchronous>, transform_indices = @transform_1, window_bounds = array<i64: 32, 128>}, {transform_indices = @transform_2, window_bounds = array<i64: 16, 128>}]} {
    %c0 = arith.constant 0 : index
    %c0_0 = arith.constant 0 : index
    %0 = vector.load %arg1[%c0, %c0_0] : memref<16x1xi32, #tpu.memory_space<vmem>>, vector<16x1xi32>
    %1 = tpu.iota {dimensions = array<i32: 1>} : vector<16x32xi32>
    %2 = vector.broadcast %0 : vector<16x1xi32> to vector<16x32xi32>
    %3 = arith.cmpi eq, %2, %1 : vector<16x32xi32>
    %4 = arith.extui %3 : vector<16x32xi1> to vector<16x32xi32>
    %5 = arith.sitofp %4 : vector<16x32xi32> to vector<16x32xf32>
    %c0_1 = arith.constant 0 : index
    %c0_2 = arith.constant 0 : index
    %6 = vector.load %arg2[%c0_1, %c0_2] : memref<32x128xf32, #tpu.memory_space<vmem>>, vector<32x128xf32>
    %cst = arith.constant dense<0.000000e+00> : vector<16x128xf32>
    %7 = tpu.matmul %5, %6, %cst {dimension_numbers = #tpu.dot_dimension_numbers<[1], [0], [0], [1], [0, 0, 1, 1], [], []>} : vector<16x32xf32>, vector<32x128xf32>, vector<16x128xf32> -> vector<16x128xf32>
    %cst_3 = arith.constant 11.3137083 : f32
    %8 = vector.broadcast %cst_3 : f32 to vector<16x128xf32>
    %9 = arith.mulf %7, %8 : vector<16x128xf32>
    %c0_4 = arith.constant 0 : index
    %c0_5 = arith.constant 0 : index
    %10 = vector.load %arg3[%c0_4, %c0_5] : memref<16x128xf32, #tpu.memory_space<vmem>>, vector<16x128xf32>
    tpu.vector_store %arg3[%c0_4, %c0_5], %9 {strides = array<i32>} : memref<16x128xf32, #tpu.memory_space<vmem>>, vector<16x128xf32>,
    return
  }
  func.func @transform_0(%arg0: i32) -> (i32, i32) {
    %c0_i32 = arith.constant 0 : i32
    %c0_i32_0 = arith.constant 0 : i32
    return %arg0, %c0_i32 : i32, i32
  }
  func.func @transform_1(%arg0: i32) -> (i32, i32) {
    %c0_i32 = arith.constant 0 : i32
    %c0_i32_0 = arith.constant 0 : i32
    %c0_i32_1 = arith.constant 0 : i32
    return %c0_i32, %c0_i32_0 : i32, i32
  }
  func.func @transform_2(%arg0: i32) -> (i32, i32) {
    %c0_i32 = arith.constant 0 : i32
    %c0_i32_0 = arith.constant 0 : i32
    return %arg0, %c0_i32 : i32, i32
  }
}

</mosaic_0001>

<bundles_post_ra>
// kernel: tpu_custom_call.1
= control target key start
LH: loop header
LB: loop body
LE: loop exit
PB: predicated region body
PF: predicated region fallthrough
CT: control target
= control target key end

     0   :  { %7 = vsyncpa [#allocation3], 0  ;;  %s340_s0 = inlined_call_operand.hbm [shape: s32[16,1], index: 0, kind: input, shape index: {}]   ;;  %s341_s1 = inlined_call_operand.hbm [shape: f32[32,128], index: 1, kind: input, shape index: {}]   ;;  %s342_s2 = inlined_call_operand.hbm [shape: f32[16,128], index: 2, kind: output, shape index: {}]  }
   0x1   :  { %8 = vsyncpa [#allocation6], 0 }
   0x2   :  { %9 = vsyncpa [#allocation4], 0  ;;  %s273_s9 = smov [#allocation2]   ;;  %s201_s13 = scalar_lea.hbm %s340_s0, 256 }
   0x3   :  { %s15_s10 = sshll.u32 %s273_s9, 4  ;;  %p202_p0 = scmp.ne.s32.totalorder %s340_s0, %s201_s13  ;;  %s16_s10 = int_to_ptr.vmem [resolvable:$true] %s15_s10 }
   0x4   :  { %p205_p1 = scmp.lt.u32.totalorder %s201_s13, %s340_s0 }
   0x6   :  { %p207_p2 = pnand %p205_p1, %p202_p0 }
   0x8   :  { %210 = shalt.err (!%p207_p2)
}
   0x9   :  { %s211_s18 = scalar_lea.vmem %s16_s10, 256  ;;  %p216_p4 = scmp.lt.s32.totalorder %s16_s10, %s16_s10 }
   0xa   :  { %p212_p3 = scmp.ne.s32.totalorder %s16_s10, %s211_s18  ;;  %p217_p5 = scmp.lt.s32.totalorder %s211_s18, %s211_s18 }
   0xc   :  { %p218_p6 = por %p217_p5, %p216_p4 }
   0xe   :  { %p219_p7 = pnand %p218_p6, %p212_p3 }
  0x10   :  { %222 = shalt.err (!%p219_p7)
}
  0x11   :  { %s274_s19 = smov 128   ;;  %s275_s20 = smov 8  }
  0x12   :  { %21 = dma.hbm_to_vmem [thread:$0]  %s340_s0, 256, %s16_s10, [#allocation3], %s274_s19, %s274_s19, %s275_s20  }
  0x13   :  { %s276_s23 = smov [#allocation5]   ;;  %s223_s27 = scalar_lea.hbm %s341_s1, 512 }
  0x14   :  { %s27_s24 = sshll.u32 %s276_s23, 4  ;;  %p224_p8 = scmp.ne.s32.totalorder %s341_s1, %s223_s27  ;;  %s28_s24 = int_to_ptr.vmem [resolvable:$true] %s27_s24 }
  0x15   :  { %p227_p9 = scmp.lt.u32.totalorder %s223_s27, %s341_s1 }
  0x17   :  { %p229_p10 = pnand %p227_p9, %p224_p8 }
  0x19   :  { %232 = shalt.err (!%p229_p10)
}
  0x1a   :  { %s233_s4 = scalar_lea.vmem %s28_s24, 512  ;;  %p238_p12 = scmp.lt.s32.totalorder %s28_s24, %s28_s24 }
  0x1b   :  { %p234_p11 = scmp.ne.s32.totalorder %s28_s24, %s233_s4  ;;  %p239_p13 = scmp.lt.s32.totalorder %s233_s4, %s233_s4 }
  0x1d   :  { %p240_p0 = por %p239_p13, %p238_p12 }
  0x1f   :  { %p241_p1 = pnand %p240_p0, %p234_p11 }
  0x21   :  { %244 = shalt.err (!%p241_p1)
}
  0x22   :  { %33 = dma.hbm_to_vmem [thread:$0]  %s341_s1, 512, %s28_s24, [#allocation6], %s274_s19, %s274_s19, %s275_s20  }
  0x23   :  { %267 = dma.done.wait [#allocation3], 256  }
  0x24   :  { %268 = vsyncadd [#allocation3], 4294967040 }
  0x25   :  { %269 = dma.done.wait [#allocation6], 512  }
  0x26   :  { %270 = vsyncadd [#allocation6], 4294966784  ;;  %v277_v0 = vmov 0   ;;  %v40_v1 = vld [vmem:[#allocation2] sm:$0xff]  ;;  %v56_v2 = vld [vmem:[#allocation5] sm:$0xff]  ;;  %v42_v9 = vlaneseq  ;;  %vm60_vm0 = vcmask 261120  }
  0x27   :  { %200 = vset.pattern.permute.xlu0 %v277_v0  ;;  %v57_v3 = vld [vmem:[#allocation5 + $0x8] sm:$0xff]  ;;  %v58_v4 = vld [vmem:[#allocation5 + $0x10] sm:$0xff]  ;;  %v59_v5 = vld [vmem:[#allocation5 + $0x18] sm:$0xff]  ;;  %v278_v12 = vmov 0.0   ;;  %s279_s1 = smov [#allocation7]  }
  0x28   :  { %45 = vperm.xlu0 %200, %v40_v1   ;;  %v41_v6 = vld [vmem:[#allocation2 + $0x8] sm:$0xff]  ;;  %v185_v7 = vpack.c.bf16 %v57_v3, %v56_v2  ;;  %v189_v8 = vpack.c.bf16 %v59_v5, %v58_v4  ;;  %v43_v10 = vand.u32 127, %v42_v9  ;;  %s151_s6 = sshll.u32 %s279_s1, 4  ;;  %s152_s6 = int_to_ptr.vmem [resolvable:$true] %s151_s6 }
  0x29   :  { %s245_s7 = scalar_lea.vmem %s152_s6, 256  ;;  %p250_p3 = scmp.lt.s32.totalorder %s152_s6, %s152_s6 }
  0x2a   :  { %186 = vmatprep.subr.bf16.mxu0 %v185_v7  ;;  %p246_p2 = scmp.ne.s32.totalorder %s152_s6, %s245_s7  ;;  %p251_p4 = scmp.lt.s32.totalorder %s245_s7, %s245_s7 }
  0x2b   :  { %188 = vmatpush3.bf16.msra.mxu0 %v185_v7 }
  0x2c   :  { %48 = vperm.xlu0 %200, %v41_v6   ;;  %190 = vmatprep.subr.bf16.mxu0 %v189_v8  ;;  %p252_p5 = por %p251_p4, %p250_p3 }
  0x2e   :  { %p253_p6 = pnand %p252_p5, %p246_p2 }
  0x2f   :  { %192 = vmatpush3.bf16.msra.mxu0 %v189_v8 }
  0xa7   :  { %v46_v11 = vpop.permute.xlu0 %45 }
  0xa8   :  { %vm50_vm1 = vcmp.eq.s32.totalorder %v46_v11, %v43_v10 }
  0xa9   :  { %v164_v13 = vsel %vm50_vm1, 1.0, %v278_v12 }
  0xaa   :  { %182 = vmatprep.mubr.msk.f32.mxu0 %vm60_vm0, %v164_v13 }
  0xab   :  { %v49_v14 = vpop.permute.xlu0 %48 }
  0xac   :  { %vm51_vm2 = vcmp.eq.s32.totalorder %v49_v14, %v43_v10 }
  0xad   :  { %v165_v15 = vsel %vm51_vm2, 1.0, %v278_v12 }
  0xae   :  { %183 = vmatmul.mubr.msk.f32.vlgmr.msra.gmra.mrb[0].mxu0 %vm60_vm0, %v165_v15 }
 0x181   :  { %v184_v16 = vpop.f32.mrb[0].mxu0 }
 0x182   :  { %v143_v17 = vmul.f32 11.313708, %v184_v16  ;;  %v133_v18 = vpop.f32.mrb[1].mxu0 }
 0x183   :  { %v142_v19 = vmul.f32 11.313708, %v133_v18 }
 0x184   :  { %145 = vst [vmem:[#allocation7 + $0x8] sm:$0xff] %v143_v17 }
 0x185   :  { %144 = vst [vmem:[#allocation7] sm:$0xff] %v142_v19 }
 0x186   :  { %256 = shalt.err (!%p253_p6)
}
 0x187   :  { %s257_s10 = scalar_lea.hbm %s342_s2, 256 }
 0x188   :  { %p258_p7 = scmp.ne.s32.totalorder %s342_s2, %s257_s10  ;;  %p261_p8 = scmp.lt.u32.totalorder %s257_s10, %s342_s2 }
 0x18a   :  { %p263_p9 = pnand %p261_p8, %p258_p7 }
 0x18c   :  { %266 = shalt.err (!%p263_p9)
}
 0x18d   :  { %157 = dma.vmem_to_hbm [thread:$0]  %s152_s6, 256, %s342_s2, [#allocation4], %s274_s19, %s274_s19, %s275_s20  }
 0x18e   :  { %271 = dma.done.wait [#allocation4], 256  }
 0x18f   :  { %272 = vsyncadd [#allocation4], 4294967040 }
 0x190   :  { %161 = vsyncpa [#allocation3], 1 }
 0x191   :  { %162 = vsyncpa [#allocation6], 1 }
 0x192   :  { %163 = vsyncpa [#allocation4], 1 }

</bundles_post_ra>
